<compile_context>
chip_gen: v5e
topology: v5e:2x2
jax: 0.10.0
libtpu: 0.0.40
codegen_flags: <defaults>
</compile_context>

<pallas_src>
import jax
import jax.numpy as jnp
import numpy as np
from jax.experimental import pallas as pl
from jax.experimental.pallas import tpu as pltpu

BN_EPS = 1e-5

INPUT_DIM = 300
HIDDEN1 = 128
HIDDEN2 = 64
OUTPUT_DIM = 250

HIDDEN2_PAD = 128   # 64  -> 128 : lane-dense layer 2 / full 128-wide MXU on v5e
OUT_PAD = 256       # 250 -> 256 : lane-dense (unmasked) output stores


def _bn_fused(h, gamma, beta, inv_b):
    """Training-mode BatchNorm1d (biased batch variance), one-pass stats,
    folded into a single per-element scale/shift FMA."""
    s = jnp.sum(h, axis=0, keepdims=True)
    ss = jnp.sum(h * h, axis=0, keepdims=True)
    mean = s * inv_b
    var = jnp.maximum(ss * inv_b - mean * mean, 0.0)  # guard tiny cancellation
    scale = gamma * jax.lax.rsqrt(var + BN_EPS)
    shift = beta - mean * scale
    return h * scale + shift


def _sigmoid(x):
    # EUP tanh form: numerically stable at the tails, matches torch.sigmoid.
    return 0.5 * (jnp.tanh(0.5 * x) + 1.0)


def global_dnn_kernel(x_ref, w1_ref, g1_ref, be1_ref,
                      w2_ref, g2_ref, be2_ref,
                      w3_ref, g3_ref, be3_ref,
                      out_ref):
    inv_b = 1.0 / x_ref.shape[0]  # static batch size

    # Layer 1: Linear(300->128) [bias folded away by training-mode BN] + BN + ReLU.
    x = x_ref[...].astype(jnp.bfloat16)  # in-kernel cast, hidden under the matmul
    h = jnp.dot(x, w1_ref[...], preferred_element_type=jnp.float32)
    h = jnp.maximum(_bn_fused(h, g1_ref[...], be1_ref[...], inv_b), 0.0)

    # Layer 2: Linear(128->64, out-dim zero-padded to 128) + BN + ReLU.
    h = jnp.dot(h.astype(jnp.bfloat16), w2_ref[...],
                preferred_element_type=jnp.float32)
    h = jnp.maximum(_bn_fused(h, g2_ref[...], be2_ref[...], inv_b), 0.0)

    # Layer 3: Linear(64->250, rows/cols zero-padded to 128/256) + BN + Sigmoid.
    # Padded output columns are exactly 0 pre-sigmoid -> 0.5 post-sigmoid.
    h = jnp.dot(h.astype(jnp.bfloat16), w3_ref[...],
                preferred_element_type=jnp.float32)
    out_ref[...] = _sigmoid(_bn_fused(h, g3_ref[...], be3_ref[...], inv_b))


def global_dnn_forward_pallas(x, params):
    """x: (B, INPUT_DIM) float32.  Returns (B, OUT_PAD) float32.
    Columns [OUTPUT_DIM:OUT_PAD) are padding (value 0.5 = sigmoid(0)); slice
    or mask them in the consumer if exactly 250 columns are needed (kept
    padded here to avoid an extra HBM round trip over the output)."""
    B = x.shape[0]
    inputs = (x,
              params["w1"], params["g1"], params["be1"],
              params["w2"], params["g2"], params["be2"],
              params["w3"], params["g3"], params["be3"])

    # Rough resident-footprint estimate with generous headroom.
    resident = (sum(int(v.nbytes) for v in inputs)
                + B * OUT_PAD * 4                                   # output
                + B * (HIDDEN1 + HIDDEN2_PAD + OUT_PAD) * 6)        # f32+bf16 temps
    vmem_limit = int(min(max(4 * resident, 32 << 20), 56 << 20))

    vmem = pl.BlockSpec(memory_space=pltpu.MemorySpace.VMEM)
    return pl.pallas_call(
        global_dnn_kernel,
        out_shape=jax.ShapeDtypeStruct((B, OUT_PAD), jnp.float32),
        in_specs=[vmem] * len(inputs),
        out_specs=vmem,
        compiler_params=pltpu.CompilerParams(vmem_limit_bytes=vmem_limit),
    )(*inputs)


def global_dnn_forward_ref(x, params):
    """Pure-JAX reference mirroring the kernel math exactly
    (bf16 matmuls, one-pass fused BN, tanh-form sigmoid, padded dims)."""
    inv_b = 1.0 / x.shape[0]
    h = jnp.dot(x.astype(jnp.bfloat16), params["w1"],
                preferred_element_type=jnp.float32)
    h = jnp.maximum(_bn_fused(h, params["g1"], params["be1"], inv_b), 0.0)
    h = jnp.dot(h.astype(jnp.bfloat16), params["w2"],
                preferred_element_type=jnp.float32)
    h = jnp.maximum(_bn_fused(h, params["g2"], params["be2"], inv_b), 0.0)
    h = jnp.dot(h.astype(jnp.bfloat16), params["w3"],
                preferred_element_type=jnp.float32)
    return _sigmoid(_bn_fused(h, params["g3"], params["be3"], inv_b))


def global_dnn_forward_f32_ref(x, f32_weights):
    """Unpadded, all-f32 reference of the original module semantics
    (biases omitted because they cancel under training-mode BN)."""
    def bn(h):
        mean = jnp.mean(h, axis=0, keepdims=True)
        var = jnp.mean((h - mean) ** 2, axis=0, keepdims=True)
        return (h - mean) * jax.lax.rsqrt(var + BN_EPS)
    w1, w2, w3 = f32_weights
    h = jnp.maximum(bn(x @ w1), 0.0)
    h = jnp.maximum(bn(h @ w2), 0.0)
    return jax.nn.sigmoid(bn(h @ w3))


def make_params(key):
    """Deterministic init mimicking PyTorch defaults:
    Linear weight ~ U(-1/sqrt(fan_in), 1/sqrt(fan_in)), BN gamma=1, beta=0.
    Linear weights stored pre-transposed (in, out), bf16, zero-padded to
    lane-dense shapes; Linear biases omitted (cancel under training-mode BN)."""
    ks = jax.random.split(key, 3)

    def lin_w(k, fan_in, fan_out):
        bound = 1.0 / np.sqrt(fan_in)
        return jax.random.uniform(k, (fan_in, fan_out), jnp.float32, -bound, bound)

    w1_f32 = lin_w(ks[0], INPUT_DIM, HIDDEN1)     # (300, 128)
    w2_f32 = lin_w(ks[1], HIDDEN1, HIDDEN2)       # (128, 64)
    w3_f32 = lin_w(ks[2], HIDDEN2, OUTPUT_DIM)    # (64, 250)

    params = {
        # layer 1: unpadded K=300 (Mosaic pads the contraction internally).
        "w1": w1_f32.astype(jnp.bfloat16),
        "g1": jnp.ones((1, HIDDEN1), jnp.float32),
        "be1": jnp.zeros((1, HIDDEN1), jnp.float32),
        # layer 2: out-dim zero-padded 64 -> 128 (padded features are exactly 0).
        "w2": jnp.pad(w2_f32, ((0, 0), (0, HIDDEN2_PAD - HIDDEN2))).astype(jnp.bfloat16),
        "g2": jnp.ones((1, HIDDEN2_PAD), jnp.float32),
        "be2": jnp.zeros((1, HIDDEN2_PAD), jnp.float32),
        # layer 3: in-dim zero-padded 64 -> 128, out-dim 250 -> 256.
        "w3": jnp.pad(w3_f32, ((0, HIDDEN2_PAD - HIDDEN2),
                               (0, OUT_PAD - OUTPUT_DIM))).astype(jnp.bfloat16),
        "g3": jnp.pad(jnp.ones((1, OUTPUT_DIM), jnp.float32),
                      ((0, 0), (0, OUT_PAD - OUTPUT_DIM))),
        "be3": jnp.zeros((1, OUT_PAD), jnp.float32),
    }
    return params, (w1_f32, w2_f32, w3_f32)


if __name__ == "__main__":
    key = jax.random.PRNGKey(0)
    k_x, k_p = jax.random.split(key)

    B = 8
    x = jax.random.normal(k_x, (B, INPUT_DIM), jnp.float32)
    params, f32_weights = make_params(k_p)

    out_padded = jax.block_until_ready(global_dnn_forward_pallas(x, params))
    assert out_padded.shape == (B, OUT_PAD)
    out_padded_np = np.asarray(out_padded)
    out = out_padded_np[:, :OUTPUT_DIM]

    # Padding columns must be sigmoid(0) = 0.5 (exact by construction).
    np.testing.assert_allclose(out_padded_np[:, OUTPUT_DIM:], 0.5, rtol=0, atol=1e-6)

    # Tight check against a pure-JAX reference with identical numerics.
    ref = np.asarray(jax.block_until_ready(
        global_dnn_forward_ref(x, params)))[:, :OUTPUT_DIM]
    np.testing.assert_allclose(out, ref, rtol=1e-4, atol=1e-4)

    # Loose check against the full-f32, unpadded original module semantics
    # (bounds the error introduced by the bf16 matmuls / one-pass variance).
    ref_f32 = np.asarray(jax.block_until_ready(
        global_dnn_forward_f32_ref(x, f32_weights)))
    np.testing.assert_allclose(out, ref_f32, rtol=0, atol=5e-2)

    # Sigmoid outputs must lie strictly in (0, 1).
    assert np.all((out > 0.0) & (out < 1.0))

    print("KERNEL_OK")
</pallas_src>

<mosaic_0001>
module attributes {stable_mosaic.version = 11 : i64} {
  func.func @global_dnn_kernel(%arg0: memref<8x300xf32, #tpu.memory_space<vmem>>, %arg1: memref<300x128xbf16, #tpu.memory_space<vmem>>, %arg2: memref<1x128xf32, #tpu.memory_space<vmem>>, %arg3: memref<1x128xf32, #tpu.memory_space<vmem>>, %arg4: memref<128x128xbf16, #tpu.memory_space<vmem>>, %arg5: memref<1x128xf32, #tpu.memory_space<vmem>>, %arg6: memref<1x128xf32, #tpu.memory_space<vmem>>, %arg7: memref<128x256xbf16, #tpu.memory_space<vmem>>, %arg8: memref<1x256xf32, #tpu.memory_space<vmem>>, %arg9: memref<1x256xf32, #tpu.memory_space<vmem>>, %arg10: memref<8x256xf32, #tpu.memory_space<vmem>>) attributes {dimension_semantics = [], scalar_prefetch = 0 : i64, scratch_operands = 0 : i64, tpu.core_type = #tpu.core_type<tc>} {
    %c0 = arith.constant 0 : index
    %c0_0 = arith.constant 0 : index
    %0 = vector.load %arg0[%c0, %c0_0] : memref<8x300xf32, #tpu.memory_space<vmem>>, vector<8x300xf32>
    %1 = arith.truncf %0 : vector<8x300xf32> to vector<8x300xbf16>
    %c0_1 = arith.constant 0 : index
    %c0_2 = arith.constant 0 : index
    %2 = vector.load %arg1[%c0_1, %c0_2] : memref<300x128xbf16, #tpu.memory_space<vmem>>, vector<300x128xbf16>
    %cst = arith.constant dense<0.000000e+00> : vector<8x128xf32>
    %3 = tpu.matmul %1, %2, %cst {dimension_numbers = #tpu.dot_dimension_numbers<[1], [0], [0], [1], [0, 0, 1, 1], [], []>} : vector<8x300xbf16>, vector<300x128xbf16>, vector<8x128xf32> -> vector<8x128xf32>
    %c0_3 = arith.constant 0 : index
    %c0_4 = arith.constant 0 : index
    %4 = vector.load %arg2[%c0_3, %c0_4] : memref<1x128xf32, #tpu.memory_space<vmem>>, vector<1x128xf32>
    %c0_5 = arith.constant 0 : index
    %c0_6 = arith.constant 0 : index
    %5 = vector.load %arg3[%c0_5, %c0_6] : memref<1x128xf32, #tpu.memory_space<vmem>>, vector<1x128xf32>
    %cst_7 = arith.constant dense<0.000000e+00> : vector<128xf32>
    %6 = vector.multi_reduction <add>, %3, %cst_7 [0] : vector<8x128xf32> to vector<128xf32>
    %7 = vector.shape_cast %6 : vector<128xf32> to vector<1x128xf32>
    %8 = arith.mulf %3, %3 : vector<8x128xf32>
    %cst_8 = arith.constant dense<0.000000e+00> : vector<128xf32>
    %9 = vector.multi_reduction <add>, %8, %cst_8 [0] : vector<8x128xf32> to vector<128xf32>
    %10 = vector.shape_cast %9 : vector<128xf32> to vector<1x128xf32>
    %cst_9 = arith.constant 1.250000e-01 : f32
    %11 = vector.broadcast %cst_9 : f32 to vector<1x128xf32>
    %12 = arith.mulf %7, %11 : vector<1x128xf32>
    %cst_10 = arith.constant 1.250000e-01 : f32
    %13 = vector.broadcast %cst_10 : f32 to vector<1x128xf32>
    %14 = arith.mulf %10, %13 : vector<1x128xf32>
    %15 = arith.mulf %12, %12 : vector<1x128xf32>
    %16 = arith.subf %14, %15 : vector<1x128xf32>
    %cst_11 = arith.constant 0.000000e+00 : f32
    %17 = vector.broadcast %cst_11 : f32 to vector<1x128xf32>
    %18 = arith.maximumf %16, %17 : vector<1x128xf32>
    %cst_12 = arith.constant 9.99999974E-6 : f32
    %19 = vector.broadcast %cst_12 : f32 to vector<1x128xf32>
    %20 = arith.addf %18, %19 : vector<1x128xf32>
    %21 = math.rsqrt %20 : vector<1x128xf32>
    %22 = arith.mulf %4, %21 : vector<1x128xf32>
    %23 = arith.mulf %12, %22 : vector<1x128xf32>
    %24 = arith.subf %5, %23 : vector<1x128xf32>
    %25 = vector.broadcast %22 : vector<1x128xf32> to vector<8x128xf32>
    %26 = arith.mulf %3, %25 : vector<8x128xf32>
    %27 = vector.broadcast %24 : vector<1x128xf32> to vector<8x128xf32>
    %28 = arith.addf %26, %27 : vector<8x128xf32>
    %cst_13 = arith.constant 0.000000e+00 : f32
    %29 = vector.broadcast %cst_13 : f32 to vector<8x128xf32>
    %30 = arith.maximumf %28, %29 : vector<8x128xf32>
    %31 = arith.truncf %30 : vector<8x128xf32> to vector<8x128xbf16>
    %c0_14 = arith.constant 0 : index
    %c0_15 = arith.constant 0 : index
    %32 = vector.load %arg4[%c0_14, %c0_15] : memref<128x128xbf16, #tpu.memory_space<vmem>>, vector<128x128xbf16>
    %cst_16 = arith.constant dense<0.000000e+00> : vector<8x128xf32>
    %33 = tpu.matmul %31, %32, %cst_16 {dimension_numbers = #tpu.dot_dimension_numbers<[1], [0], [0], [1], [0, 0, 1, 1], [], []>} : vector<8x128xbf16>, vector<128x128xbf16>, vector<8x128xf32> -> vector<8x128xf32>
    %c0_17 = arith.constant 0 : index
    %c0_18 = arith.constant 0 : index
    %34 = vector.load %arg5[%c0_17, %c0_18] : memref<1x128xf32, #tpu.memory_space<vmem>>, vector<1x128xf32>
    %c0_19 = arith.constant 0 : index
    %c0_20 = arith.constant 0 : index
    %35 = vector.load %arg6[%c0_19, %c0_20] : memref<1x128xf32, #tpu.memory_space<vmem>>, vector<1x128xf32>
    %cst_21 = arith.constant dense<0.000000e+00> : vector<128xf32>
    %36 = vector.multi_reduction <add>, %33, %cst_21 [0] : vector<8x128xf32> to vector<128xf32>
    %37 = vector.shape_cast %36 : vector<128xf32> to vector<1x128xf32>
    %38 = arith.mulf %33, %33 : vector<8x128xf32>
    %cst_22 = arith.constant dense<0.000000e+00> : vector<128xf32>
    %39 = vector.multi_reduction <add>, %38, %cst_22 [0] : vector<8x128xf32> to vector<128xf32>
    %40 = vector.shape_cast %39 : vector<128xf32> to vector<1x128xf32>
    %cst_23 = arith.constant 1.250000e-01 : f32
    %41 = vector.broadcast %cst_23 : f32 to vector<1x128xf32>
    %42 = arith.mulf %37, %41 : vector<1x128xf32>
    %cst_24 = arith.constant 1.250000e-01 : f32
    %43 = vector.broadcast %cst_24 : f32 to vector<1x128xf32>
    %44 = arith.mulf %40, %43 : vector<1x128xf32>
    %45 = arith.mulf %42, %42 : vector<1x128xf32>
    %46 = arith.subf %44, %45 : vector<1x128xf32>
    %cst_25 = arith.constant 0.000000e+00 : f32
    %47 = vector.broadcast %cst_25 : f32 to vector<1x128xf32>
    %48 = arith.maximumf %46, %47 : vector<1x128xf32>
    %cst_26 = arith.constant 9.99999974E-6 : f32
    %49 = vector.broadcast %cst_26 : f32 to vector<1x128xf32>
    %50 = arith.addf %48, %49 : vector<1x128xf32>
    %51 = math.rsqrt %50 : vector<1x128xf32>
    %52 = arith.mulf %34, %51 : vector<1x128xf32>
    %53 = arith.mulf %42, %52 : vector<1x128xf32>
    %54 = arith.subf %35, %53 : vector<1x128xf32>
    %55 = vector.broadcast %52 : vector<1x128xf32> to vector<8x128xf32>
    %56 = arith.mulf %33, %55 : vector<8x128xf32>
    %57 = vector.broadcast %54 : vector<1x128xf32> to vector<8x128xf32>
    %58 = arith.addf %56, %57 : vector<8x128xf32>
    %cst_27 = arith.constant 0.000000e+00 : f32
    %59 = vector.broadcast %cst_27 : f32 to vector<8x128xf32>
    %60 = arith.maximumf %58, %59 : vector<8x128xf32>
    %61 = arith.truncf %60 : vector<8x128xf32> to vector<8x128xbf16>
    %c0_28 = arith.constant 0 : index
    %c0_29 = arith.constant 0 : index
    %62 = vector.load %arg7[%c0_28, %c0_29] : memref<128x256xbf16, #tpu.memory_space<vmem>>, vector<128x256xbf16>
    %cst_30 = arith.constant dense<0.000000e+00> : vector<8x256xf32>
    %63 = tpu.matmul %61, %62, %cst_30 {dimension_numbers = #tpu.dot_dimension_numbers<[1], [0], [0], [1], [0, 0, 1, 1], [], []>} : vector<8x128xbf16>, vector<128x256xbf16>, vector<8x256xf32> -> vector<8x256xf32>
    %c0_31 = arith.constant 0 : index
    %c0_32 = arith.constant 0 : index
    %64 = vector.load %arg8[%c0_31, %c0_32] : memref<1x256xf32, #tpu.memory_space<vmem>>, vector<1x256xf32>
    %c0_33 = arith.constant 0 : index
    %c0_34 = arith.constant 0 : index
    %65 = vector.load %arg9[%c0_33, %c0_34] : memref<1x256xf32, #tpu.memory_space<vmem>>, vector<1x256xf32>
    %cst_35 = arith.constant dense<0.000000e+00> : vector<256xf32>
    %66 = vector.multi_reduction <add>, %63, %cst_35 [0] : vector<8x256xf32> to vector<256xf32>
    %67 = vector.shape_cast %66 : vector<256xf32> to vector<1x256xf32>
    %68 = arith.mulf %63, %63 : vector<8x256xf32>
    %cst_36 = arith.constant dense<0.000000e+00> : vector<256xf32>
    %69 = vector.multi_reduction <add>, %68, %cst_36 [0] : vector<8x256xf32> to vector<256xf32>
    %70 = vector.shape_cast %69 : vector<256xf32> to vector<1x256xf32>
    %cst_37 = arith.constant 1.250000e-01 : f32
    %71 = vector.broadcast %cst_37 : f32 to vector<1x256xf32>
    %72 = arith.mulf %67, %71 : vector<1x256xf32>
    %cst_38 = arith.constant 1.250000e-01 : f32
    %73 = vector.broadcast %cst_38 : f32 to vector<1x256xf32>
    %74 = arith.mulf %70, %73 : vector<1x256xf32>
    %75 = arith.mulf %72, %72 : vector<1x256xf32>
    %76 = arith.subf %74, %75 : vector<1x256xf32>
    %cst_39 = arith.constant 0.000000e+00 : f32
    %77 = vector.broadcast %cst_39 : f32 to vector<1x256xf32>
    %78 = arith.maximumf %76, %77 : vector<1x256xf32>
    %cst_40 = arith.constant 9.99999974E-6 : f32
    %79 = vector.broadcast %cst_40 : f32 to vector<1x256xf32>
    %80 = arith.addf %78, %79 : vector<1x256xf32>
    %81 = math.rsqrt %80 : vector<1x256xf32>
    %82 = arith.mulf %64, %81 : vector<1x256xf32>
    %83 = arith.mulf %72, %82 : vector<1x256xf32>
    %84 = arith.subf %65, %83 : vector<1x256xf32>
    %85 = vector.broadcast %82 : vector<1x256xf32> to vector<8x256xf32>
    %86 = arith.mulf %63, %85 : vector<8x256xf32>
    %87 = vector.broadcast %84 : vector<1x256xf32> to vector<8x256xf32>
    %88 = arith.addf %86, %87 : vector<8x256xf32>
    %cst_41 = arith.constant 5.000000e-01 : f32
    %89 = vector.broadcast %cst_41 : f32 to vector<8x256xf32>
    %90 = arith.mulf %89, %88 : vector<8x256xf32>
    %91 = math.tanh %90 : vector<8x256xf32>
    %cst_42 = arith.constant 1.000000e+00 : f32
    %92 = vector.broadcast %cst_42 : f32 to vector<8x256xf32>
    %93 = arith.addf %91, %92 : vector<8x256xf32>
    %cst_43 = arith.constant 5.000000e-01 : f32
    %94 = vector.broadcast %cst_43 : f32 to vector<8x256xf32>
    %95 = arith.mulf %94, %93 : vector<8x256xf32>
    %c0_44 = arith.constant 0 : index
    %c0_45 = arith.constant 0 : index
    %96 = vector.load %arg10[%c0_44, %c0_45] : memref<8x256xf32, #tpu.memory_space<vmem>>, vector<8x256xf32>
    tpu.vector_store %arg10[%c0_44, %c0_45], %95 {strides = array<i32>} : memref<8x256xf32, #tpu.memory_space<vmem>>, vector<8x256xf32>,
    return
  }
}

</mosaic_0001>

<bundles_post_ra>
// kernel: tpu_custom_call.1
= control target key start
LH: loop header
LB: loop body
LE: loop exit
PB: predicated region body
PF: predicated region fallthrough
CT: control target
= control target key end

     0   :  { %15 = vsyncpa [#allocation3], 0  ;;  %s1317_s0 = inlined_call_operand.hbm [shape: f32[8,300], index: 0, kind: input, shape index: {}]   ;;  %s1318_s1 = inlined_call_operand.hbm [shape: bf16[300,128], index: 1, kind: input, shape index: {}]   ;;  %s1319_s2 = inlined_call_operand.hbm [shape: f32[1,128], index: 2, kind: input, shape index: {}]   ;;  %s1320_s3 = inlined_call_operand.hbm [shape: f32[1,128], index: 3, kind: input, shape index: {}]   ;;  %s1321_s4 = inlined_call_operand.hbm [shape: bf16[128,128], index: 4, kind: input, shape index: {}]   ;;  %s1322_s5 = inlined_call_operand.hbm [shape: f32[1,128], index: 5, kind: input, shape index: {}]   ;;  %s1323_s6 = inlined_call_operand.vmem [shape: f32[1,128], index: 6, kind: input, shape index: {}]   ;;  %s1324_s7 = inlined_call_operand.hbm [shape: bf16[128,256], index: 7, kind: input, shape index: {}]   ;;  %s1325_s8 = inlined_call_operand.vmem [shape: f32[1,256], index: 8, kind: input, shape index: {}]   ;;  %s1326_s9 = inlined_call_operand.vmem [shape: f32[1,256], index: 9, kind: input, shape index: {}]   ;;  %s1327_s10 = inlined_call_operand.hbm [shape: f32[8,256], index: 10, kind: output, shape index: {}]  }
   0x1   :  { %16 = vsyncpa [#allocation6], 0 }
   0x2   :  { %17 = vsyncpa [#allocation9], 0 }
   0x3   :  { %18 = vsyncpa [#allocation12], 0  ;;  %s35_s15 = sshll.u32 %s1318_s1, 4  ;;  %s36_s15 = int_to_ptr.hbm [resolvable:$true] %s35_s15 }
   0x4   :  { %19 = vsyncpa [#allocation4], 0  ;;  %s1190_s16 = smov [#allocation5]   ;;  %s60_s20 = sshll.u32 %s1320_s3, 4  ;;  %s61_s20 = int_to_ptr.hbm [resolvable:$true] %s60_s20 }
   0x5   :  { %s37_s17 = sshll.u32 %s1190_s16, 4  ;;  %s1191_s21 = smov 64   ;;  %s38_s17 = int_to_ptr.vmem [resolvable:$true] %s37_s17 }
   0x6   :  { %s1192_s22 = smov 4   ;;  %s1193_s23 = smov [#allocation8]  }
   0x7   :  { %43 = dma.hbm_to_vmem [thread:$0]  %s36_s15, 2432, %s38_s17, [#allocation6], %s1191_s21, %s1191_s21, %s1192_s22  }
   0x8   :  { %s62_s24 = sshll.u32 %s1193_s23, 4  ;;  %s84_s26 = sshll.u32 %s1322_s5, 4  ;;  %s63_s24 = int_to_ptr.vmem [resolvable:$true] %s62_s24  ;;  %s85_s26 = int_to_ptr.hbm [resolvable:$true] %s84_s26 }
   0x9   :  { %65 = dma.hbm_to_vmem [thread:$0]  %s61_s20, 16, %s63_s24, [#allocation9]  }
   0xa   :  { %s25_s3 = sshll.u32 %s1317_s0, 4  ;;  %s1194_s29 = smov [#allocation11]   ;;  %s26_s3 = int_to_ptr.hbm [resolvable:$true] %s25_s3 }
   0xb   :  { %s86_s30 = sshll.u32 %s1194_s29, 4  ;;  %s1195_s11 = smov [#allocation2]   ;;  %s87_s30 = int_to_ptr.vmem [resolvable:$true] %s86_s30 }
   0xc   :  { %89 = dma.hbm_to_vmem [thread:$0]  %s85_s26, 16, %s87_s30, [#allocation12]  }
   0xd   :  { %s27_s12 = sshll.u32 %s1195_s11, 4  ;;  %s49_s15 = sshll.u32 %s1319_s2, 4  ;;  %s28_s12 = int_to_ptr.vmem [resolvable:$true] %s27_s12  ;;  %s50_s15 = int_to_ptr.hbm [resolvable:$true] %s49_s15 }
   0xe   :  { %30 = dma.hbm_to_vmem [thread:$0]  %s26_s3, 384, %s28_s12, [#allocation3]  }
   0xf   :  { %s70_s17 = sshll.u32 %s1321_s4, 4  ;;  %s1196_s18 = smov [#allocation7]   ;;  %s71_s17 = int_to_ptr.hbm [resolvable:$true] %s70_s17 }
  0x10   :  { %s51_s0 = sshll.u32 %s1196_s18, 4  ;;  %s1197_s19 = smov [#allocation10]   ;;  %s52_s0 = int_to_ptr.vmem [resolvable:$true] %s51_s0 }
  0x11   :  { %54 = dma.hbm_to_vmem [thread:$0]  %s50_s15, 16, %s52_s0, [#allocation6]  }
  0x12   :  { %s72_s20 = sshll.u32 %s1197_s19, 4  ;;  %s96_s25 = sshll.u32 %s1324_s7, 4  ;;  %s73_s20 = int_to_ptr.vmem [resolvable:$true] %s72_s20  ;;  %s97_s25 = int_to_ptr.hbm [resolvable:$true] %s96_s25 }
  0x13   :  { %78 = dma.hbm_to_vmem [thread:$0]  %s71_s17, 1024, %s73_s20, [#allocation9], %s1191_s21, %s1191_s21, %s1192_s22  }
  0x14   :  { %s1198_s2 = smov [#allocation13]   ;;  %s1199_s4 = smov 128  }
  0x15   :  { %s98_s1 = sshll.u32 %s1198_s2, 4  ;;  %s1200_s26 = smov 8   ;;  %s99_s1 = int_to_ptr.vmem [resolvable:$true] %s98_s1 }
  0x16   :  { %104 = dma.hbm_to_vmem [thread:$0]  %s97_s25, 2048, %s99_s1, [#allocation12], %s1199_s4, %s1199_s4, %s1200_s26  }
  0x17   :  { %1180 = dma.done.wait [#allocation3], 384  }
  0x18   :  { %1181 = vsyncadd [#allocation3], 4294966912 }
  0x19   :  { %1182 = dma.done.wait [#allocation6], 2448  }
  0x1a   :  { %1183 = vsyncadd [#allocation6], 4294964848 }
  0x1b   :  { %1184 = dma.done.wait [#allocation9], 1040  }
  0x1c   :  { %1185 = vsyncadd [#allocation9], 4294966256 }
  0x1d   :  { %1186 = dma.done.wait [#allocation12], 2064  }
  0x1e   :  { %1187 = vsyncadd [#allocation12], 4294965232  ;;  %v928_v0 = vld [vmem:[#allocation5 + $0x38] sm:$0xff]  ;;  %v927_v2 = vld [vmem:[#allocation5 + $0x30] sm:$0xff]  ;;  %vm299_vm0 = vcmask 1045504   ;;  %vm295_vm1 = vcmask 359424  }
  0x1f   :  { %v936_v1 = vld [vmem:[#allocation5 + $0x78] sm:$0xff]  ;;  %303 = vmatpush.bf16.msra.mxu0 %v928_v0  ;;  %v935_v3 = vld [vmem:[#allocation5 + $0x70] sm:$0xff]  ;;  %v926_v8 = vld [vmem:[#allocation5 + $0x28] sm:$0xff]  ;;  %vm692_vm13 = vcmask 1040384   ;;  %s735_s30 = sshll.u32 %s1327_s10, 4  ;;  %s736_s30 = int_to_ptr.hbm [resolvable:$true] %s735_s30 }
  0x20   :  { %316 = vmatpush.bf16.msra.mxu1 %v936_v1  ;;  %v822_v4 = vld [vmem:[#allocation5 + $0x90] sm:$0xf]  ;;  %v939_v5 = vld [vmem:[#allocation5 + $0x90] sm:$0x30]  ;;  %v934_v9 = vld [vmem:[#allocation5 + $0x68] sm:$0xff] }
  0x21   :  { %v823_v6 = vor.u32 %v939_v5, %v822_v4  ;;  %v938_v10 = vld [vmem:[#allocation5 + $0x88] sm:$0xff]  ;;  %v925_v11 = vld [vmem:[#allocation5 + $0x20] sm:$0xff]  ;;  %v140_v14 = vld [vmem:[#allocation2 + $0x10] sm:$0xff] }
  0x22   :  { %v933_v12 = vld [vmem:[#allocation5 + $0x60] sm:$0xff]  ;;  %v924_v15 = vld [vmem:[#allocation5 + $0x18] sm:$0xff]  ;;  %v143_v17 = vpack.c.bf16 %v140_v14, %v140_v14  ;;  %v923_v18 = vld [vmem:[#allocation5 + $0x10] sm:$0xff] }
  0x23   :  { %v301_v7 = vsel %vm299_vm0, %v823_v6, 0  ;;  %304 = vmatpush.bf16.msra.mxu0 %v927_v2  ;;  %v937_v13 = vld [vmem:[#allocation5 + $0x80] sm:$0xff]  ;;  %v932_v16 = vld [vmem:[#allocation5 + $0x58] sm:$0xff]  ;;  %v931_v19 = vld [vmem:[#allocation5 + $0x50] sm:$0xff] }
  0x24   :  { %317 = vmatpush.bf16.msra.mxu1 %v935_v3  ;;  %334 = vmatpush.bf16.msra.mxu2 %v301_v7  ;;  %v922_v20 = vld [vmem:[#allocation5 + $0x8] sm:$0xff]  ;;  %v921_v22 = vld [vmem:[#allocation5] sm:$0xff]  ;;  %v139_v25 = vld [vmem:[#allocation2 + $0x8] sm:$0xff] }
  0x25   :  { %v930_v21 = vld [vmem:[#allocation5 + $0x48] sm:$0xff]  ;;  %v929_v23 = vld [vmem:[#allocation5 + $0x40] sm:$0xff]  ;;  %v142_v27 = vpack.c.bf16 %v139_v25, %v139_v25  ;;  %v947_v28 = vld [vmem:[#allocation10 + $0x38] sm:$0xff] }
  0x26   :  { %v138_v24 = vld [vmem:[#allocation2] sm:$0xff]  ;;  %450 = vmatpush.bf16.msra.mxu3 %v947_v28  ;;  %v944_v32 = vld [vmem:[#allocation10 + $0x20] sm:$0xff]  ;;  %v943_v33 = vld [vmem:[#allocation10 + $0x18] sm:$0xff] }
  0x27   :  { %305 = vmatpush.bf16.msra.mxu0 %v926_v8  ;;  %v141_v26 = vpack.c.bf16 %v138_v24, %v138_v24  ;;  %v946_v29 = vld [vmem:[#allocation10 + $0x30] sm:$0xff]  ;;  %v945_v30 = vld [vmem:[#allocation10 + $0x28] sm:$0xff]  ;;  %v940_v49 = vld [vmem:[#allocation10] sm:$0xff] }
  0x28   :  { %318 = vmatpush.bf16.msra.mxu1 %v934_v9  ;;  %335 = vmatpush.bf16.msra.mxu2 %v938_v10  ;;  %v942_v38 = vld [vmem:[#allocation10 + $0x10] sm:$0xff]  ;;  %v941_v42 = vld [vmem:[#allocation10 + $0x8] sm:$0xff]  ;;  %v342_v4 = vld [vmem:[#allocation7] sm:$0x1] }
  0x29   :  { %v343_v8 = vld [vmem:[#allocation8] sm:$0x1]  ;;  %v961_v24 = vld [vmem:[#allocation13 + $0x64] sm:$0xf0]  ;;  %v960_v25 = vld [vmem:[#allocation13 + $0x64] sm:$0xf] }
  0x2a   :  { %451 = vmatpush.bf16.msra.mxu3 %v946_v29  ;;  %v899_v29 = vld [vmem:[#allocation13 + $0x50] sm:$0xf] }
  0x2b   :  { %306 = vmatpush.bf16.msra.mxu0 %v925_v11 }
  0x2c   :  { %319 = vmatpush.bf16.msra.mxu1 %v933_v12  ;;  %336 = vmatpush.bf16.msra.mxu2 %v937_v13 }
  0x2e   :  { %452 = vmatpush.bf16.msra.mxu3 %v945_v30  ;;  %v959_v30 = vld [vmem:[#allocation13 + $0x54] sm:$0xf0] }
  0x2f   :  { %307 = vmatpush.bf16.msra.mxu0 %v924_v15  ;;  %824 = vmatmul.msk.bf16.vlgmr.msra.gmra.mxu2 %vm295_vm1, %v143_v17  ;;  %v915_v17 = vld [vmem:[#allocation13 + $0x70] sm:$0xf] }
  0x30   :  { %320 = vmatpush.bf16.msra.mxu1 %v932_v16 }
  0x32   :  { %453 = vmatpush.bf16.msra.mxu3 %v944_v32  ;;  %v900_v32 = vor.u32 %v959_v30, %v899_v29 }
  0x33   :  { %308 = vmatpush.bf16.msra.mxu0 %v923_v18  ;;  %v963_v18 = vld [vmem:[#allocation13 + $0x74] sm:$0xf0] }
  0x34   :  { %321 = vmatpush.bf16.msra.mxu1 %v931_v19  ;;  %v962_v19 = vld [vmem:[#allocation13 + $0x74] sm:$0xf] }
  0x36   :  { %454 = vmatpush.bf16.msra.mxu3 %v943_v33  ;;  %v901_v33 = vld [vmem:[#allocation13 + $0x58] sm:$0xf0] }
  0x37   :  { %309 = vmatpush.bf16.msra.mxu0 %v922_v20  ;;  %v916_v20 = vor.u32 %v963_v18, %v915_v17  ;;  %v861_v17 = vld [vmem:[#allocation13 + $0x8] sm:$0xf0] }
  0x38   :  { %322 = vmatpush.bf16.msra.mxu1 %v930_v21  ;;  %v917_v21 = vld [vmem:[#allocation13 + $0x78] sm:$0xf0] }
  0x39   :  { %603 = vmatpush.bf16.msrb.mxu2 %v916_v20 }
  0x3a   :  { %455 = vmatpush.bf16.msra.mxu3 %v942_v38  ;;  %v891_v38 = vld [vmem:[#allocation13 + $0x40] sm:$0xf] }
  0x3b   :  { %310 = vmatpush.bf16.msra.mxu0 %v921_v22  ;;  %v920_v22 = vor.u32 %v962_v19, %v917_v21 }
  0x3c   :  { %323 = vmatpush.bf16.msra.mxu1 %v929_v23  ;;  %v907_v23 = vld [vmem:[#allocation13 + $0x60] sm:$0xf] }
  0x3e   :  { %311 = vmatmul.bf16.vlgmr.msra.gmra.mxu0 %v141_v26  ;;  %456 = vmatpush.bf16.msra.mxu3 %v941_v42  ;;  %v908_v26 = vor.u32 %v961_v24, %v907_v23  ;;  %v893_v42 = vld [vmem:[#allocation13 + $0x48] sm:$0xf0] }
  0x3f   :  { %324 = vmatmul.bf16.vlgmr.msra.gmra.mxu1 %v142_v27  ;;  %616 = vmatpush.bf16.msrb.mxu0 %v920_v22  ;;  %v909_v27 = vld [vmem:[#allocation13 + $0x68] sm:$0xf0] }
  0x40   :  { %v912_v28 = vor.u32 %v960_v25, %v909_v27  ;;  %604 = vmatpush.bf16.msrb.mxu2 %v908_v26  ;;  %v463_v27 = vld [vmem:[#allocation11] sm:$0x1] }
  0x42   :  { %457 = vmatpush.bf16.msra.mxu3 %v940_v49  ;;  %v955_v49 = vld [vmem:[#allocation13 + $0x34] sm:$0xf0] }
  0x43   :  { %617 = vmatpush.bf16.msrb.mxu0 %v912_v28 }
  0x44   :  { %605 = vmatpush.bf16.msrb.mxu2 %v900_v32 }
  0xb2   :  { %v338_v31 = vpop.f32.mrf.mxu2 }
  0xba   :  { %v340_v37 = vpop.f32.mrf.mxu2 }
  0xbb   :  { %v312_v34 = vpop.f32.mrf.mxu0 }
  0xbc   :  { %v325_v35 = vpop.f32.mrf.mxu1 }
  0xbd   :  { %v326_v36 = vadd.f32 %v325_v35, %v312_v34 }
  0xbf   :  { %v339_v39 = vadd.f32 %v338_v31, %v326_v36  ;;  %v958_v31 = vld [vmem:[#allocation13 + $0x54] sm:$0xf] }
  0xc0   :  { %v904_v34 = vor.u32 %v958_v31, %v901_v33  ;;  %v464_v31 = vld [vmem:[%s1323_s6] sm:$0x1] }
  0xc1   :  { %v344_v40 = vrot.slane %v339_v39, 4  ;;  %v350_v41 = vmul.f32 %v339_v39, %v339_v39 }
  0xc2   :  { %618 = vmatpush.bf16.msrb.mxu0 %v904_v34 }
  0xc3   :  { %v345_v43 = vadd.f32 %v344_v40, %v339_v39  ;;  %v351_v44 = vrot.slane %v350_v41, 4  ;;  %v314_v45 = vpop.f32.mrf.mxu0 }
  0xc4   :  { %v327_v46 = vpop.f32.mrf.mxu1 }
  0xc5   :  { %v346_v47 = vrot.slane %v345_v43, 2  ;;  %v352_v48 = vadd.f32 %v351_v44, %v350_v41  ;;  %v956_v41 = vld [vmem:[#allocation13 + $0x44] sm:$0xf] }
  0xc6   :  { %v896_v45 = vor.u32 %v956_v41, %v893_v42 }
  0xc7   :  { %v353_v50 = vrot.slane %v352_v48, 2  ;;  %v347_v51 = vadd.f32 %v346_v47, %v345_v43 }
  0xc8   :  { %619 = vmatpush.bf16.msrb.mxu0 %v896_v45 }
  0xc9   :  { %v354_v52 = vadd.f32 %v353_v50, %v352_v48  ;;  %v348_v53 = vrot.slane %v347_v51, 1  ;;  %v883_v48 = vld [vmem:[#allocation13 + $0x30] sm:$0xf] }
  0xca   :  { %v884_v50 = vor.u32 %v955_v49, %v883_v48 }
  0xcb   :  { %v355_v54 = vrot.slane %v354_v52, 1  ;;  %v349_v55 = vadd.f32 %v348_v53, %v347_v51  ;;  %v954_v51 = vld [vmem:[#allocation13 + $0x34] sm:$0xf] }
  0xcd   :  { %v356_v56 = vadd.f32 %v355_v54, %v354_v52  ;;  %v357_v57 = vmul.f32 0.125, %v349_v55  ;;  %v885_v52 = vld [vmem:[#allocation13 + $0x38] sm:$0xf0] }
  0xce   :  { %v888_v55 = vor.u32 %v954_v51, %v885_v52 }
  0xcf   :  { %v358_v58 = vmul.f32 0.125, %v356_v56  ;;  %v359_v59 = vmul.f32 %v357_v57, %v357_v57 }
  0xd0   :  { %620 = vmatpush.bf16.msrb.mxu0 %v888_v55 }
  0xd1   :  { %v360_v60 = vsub.f32 %v358_v58, %v359_v59  ;;  %v875_v59 = vld [vmem:[#allocation13 + $0x20] sm:$0xf] }
  0xd3   :  { %v361_v61 = vmax.f32 %v360_v60, 0.0  ;;  %v953_v60 = vld [vmem:[#allocation13 + $0x24] sm:$0xf0] }
  0xd5   :  { %v362_v62 = vadd.f32 1e-05, %v361_v61  ;;  %v876_v61 = vor.u32 %v953_v60, %v875_v59 }
  0xd7   :  { %976 = vrsqrt.f32 %v362_v62  ;;  %vm369_vm3 = vweird.f32 %v362_v62 }
  0xdd   :  { %v977_v63 = vpop.eup %976 }
  0xde   :  { %v364_v0 = vmul.f32 %v977_v63, %v362_v62  ;;  %vm370_vm2 = vweird.f32 %v977_v63  ;;  %v952_v62 = vld [vmem:[#allocation13 + $0x24] sm:$0xf] }
  0xdf   :  { %vm371_vm4 = vmor %vm369_vm3, %vm370_vm2 }
  0xe0   :  { %v365_v1 = vmul.f32 %v977_v63, %v364_v0 }
  0xe2   :  { %v366_v2 = vmul.f32 0.5, %v365_v1 }
  0xe4   :  { %v367_v3 = vsub.f32 1.5, %v366_v2 }
  0xe6   :  { %v368_v5 = vmul.f32 %v977_v63, %v367_v3 }
  0xe8   :  { %v372_v6 = vsel %vm371_vm4, %v977_v63, %v368_v5  ;;  %v877_v63 = vld [vmem:[#allocation13 + $0x28] sm:$0xf0]  ;;  %v867_v5 = vld [vmem:[#allocation13 + $0x10] sm:$0xf] }
  0xe9   :  { %v373_v7 = vmul.f32 %v372_v6, %v342_v4  ;;  %v880_v2 = vor.u32 %v952_v62, %v877_v63  ;;  %v951_v6 = vld [vmem:[#allocation13 + $0x14] sm:$0xf0] }
  0xeb   :  { %v374_v9 = vmul.f32 %v373_v7, %v357_v57  ;;  %v377_v10 = vperm.slane %v373_v7, 0  ;;  %621 = vmatpush.bf16.msrb.mxu0 %v880_v2  ;;  %v868_v7 = vor.u32 %v951_v6, %v867_v5 }
  0xed   :  { %v375_v11 = vsub.f32 %v343_v8, %v374_v9  ;;  %v379_v12 = vmul.f32 %v377_v10, %v339_v39  ;;  %v957_v39 = vld [vmem:[#allocation13 + $0x44] sm:$0xf0]  ;;  %v950_v8 = vld [vmem:[#allocation13 + $0x14] sm:$0xf]  ;;  %v869_v9 = vld [vmem:[#allocation13 + $0x18] sm:$0xf0] }
  0xee   :  { %v892_v40 = vor.u32 %v957_v39, %v891_v38  ;;  %v859_v10 = vld [vmem:[#allocation13] sm:$0xf] }
  0xef   :  { %v381_v13 = vperm.slane %v375_v11, 0 }
  0xf0   :  { %606 = vmatpush.bf16.msrb.mxu2 %v892_v40 }
  0xf1   :  { %v383_v14 = vadd.f32 %v381_v13, %v379_v12  ;;  %v872_v13 = vor.u32 %v950_v8, %v869_v9 }
  0xf3   :  { %v384_v15 = vmax.f32 %v383_v14, 0.0  ;;  %v949_v14 = vld [vmem:[#allocation13 + $0x4] sm:$0xf0]  ;;  %622 = vmatpush.bf16.msrb.mxu0 %v872_v13 }
  0xf4   :  { %607 = vmatpush.bf16.msrb.mxu2 %v884_v50 }
  0xf5   :  { %v385_v16 = vpack.c.bf16 %v384_v15, %v384_v15  ;;  %v948_v15 = vld [vmem:[#allocation13 + $0x4] sm:$0xf] }
  0xf6   :  { %v864_v19 = vor.u32 %v948_v15, %v861_v17 }
  0xf7   :  { %458 = vmatmul.bf16.vlgmr.msra.gmra.mxu3 %v385_v16  ;;  %v860_v16 = vor.u32 %v949_v14, %v859_v10 }
  0xf8   :  { %608 = vmatpush.bf16.msrb.mxu2 %v876_v61  ;;  %623 = vmatpush.bf16.msrb.mxu0 %v864_v19 }
  0xfc   :  { %609 = vmatpush.bf16.msrb.mxu2 %v868_v7 }
 0x100   :  { %610 = vmatpush.bf16.msrb.mxu2 %v860_v16 }
 0x17a   :  { %v1284_v35 = vpop.f32.mrf.mxu3 }
 0x17b   :  { %v465_v36 = vrot.slane %v1284_v35, 4  ;;  %v471_v37 = vmul.f32 %v1284_v35, %v1284_v35 }
 0x17d   :  { %v466_v43 = vadd.f32 %v465_v36, %v1284_v35  ;;  %v472_v44 = vrot.slane %v471_v37, 4 }
 0x17f   :  { %v467_v46 = vrot.slane %v466_v43, 2  ;;  %v473_v47 = vadd.f32 %v472_v44, %v471_v37 }
 0x181   :  { %v468_v53 = vadd.f32 %v467_v46, %v466_v43  ;;  %v474_v54 = vrot.slane %v473_v47, 2 }
 0x182   :  { %v461_v56 = vpop.f32.mrf.mxu3 }
 0x183   :  { %v469_v57 = vrot.slane %v468_v53, 1  ;;  %v475_v58 = vadd.f32 %v474_v54, %v473_v47 }
 0x185   :  { %v470_v0 = vadd.f32 %v469_v57, %v468_v53  ;;  %v476_v1 = vrot.slane %v475_v58, 1 }
 0x187   :  { %v477_v3 = vadd.f32 %v476_v1, %v475_v58  ;;  %v478_v4 = vmul.f32 0.125, %v470_v0 }
 0x189   :  { %v479_v11 = vmul.f32 0.125, %v477_v3  ;;  %v480_v12 = vmul.f32 %v478_v4, %v478_v4 }
 0x18b   :  { %v481_v18 = vsub.f32 %v479_v11, %v480_v12 }
 0x18d   :  { %v482_v20 = vmax.f32 %v481_v18, 0.0 }
 0x18f   :  { %v483_v21 = vadd.f32 1e-05, %v482_v20 }
 0x191   :  { %978 = vrsqrt.f32 %v483_v21  ;;  %vm490_vm6 = vweird.f32 %v483_v21 }
 0x197   :  { %v979_v22 = vpop.eup %978 }
 0x198   :  { %v485_v23 = vmul.f32 %v979_v22, %v483_v21  ;;  %vm491_vm5 = vweird.f32 %v979_v22 }
 0x199   :  { %vm492_vm7 = vmor %vm490_vm6, %vm491_vm5 }
 0x19a   :  { %v486_v24 = vmul.f32 %v979_v22, %v485_v23 }
 0x19c   :  { %v487_v25 = vmul.f32 0.5, %v486_v24 }
 0x19e   :  { %v488_v26 = vsub.f32 1.5, %v487_v25 }
 0x1a0   :  { %v489_v28 = vmul.f32 %v979_v22, %v488_v26 }
 0x1a2   :  { %v493_v29 = vsel %vm492_vm7, %v979_v22, %v489_v28 }
 0x1a3   :  { %v494_v30 = vmul.f32 %v493_v29, %v463_v27 }
 0x1a5   :  { %v498_v32 = vperm.slane %v494_v30, 0  ;;  %v495_v33 = vmul.f32 %v494_v30, %v478_v4 }
 0x1a7   :  { %v496_v34 = vsub.f32 %v464_v31, %v495_v33  ;;  %v500_v36 = vmul.f32 %v498_v32, %v1284_v35  ;;  %v629_v31 = vld [vmem:[%s1325_s8] sm:$0x3]  ;;  %s1201_s8 = smov [#allocation14]  }
 0x1a9   :  { %v502_v37 = vperm.slane %v496_v34, 0 }
 0x1ab   :  { %v504_v38 = vadd.f32 %v502_v37, %v500_v36 }
 0x1ad   :  { %v505_v39 = vmax.f32 %v504_v38, 0.0 }
 0x1af   :  { %v506_v40 = vpack.c.bf16 %v505_v39, %v505_v39 }
 0x1b1   :  { %611 = vmatmul.bf16.vlgmr.msrb.gmra.mxu2 %v506_v40  ;;  %624 = vmatmul.bf16.vlgmr.msrb.gmra.mxu0 %v506_v40  ;;  %v630_v40 = vld [vmem:[%s1326_s9] sm:$0x3]  ;;  %s733_s9 = sshll.u32 %s1201_s8, 4  ;;  %s734_s9 = int_to_ptr.vmem [resolvable:$true] %s733_s9 }
 0x22e   :  { %v1294_v41 = vpop.f32.mrf.mxu0 }
 0x22f   :  { %v637_v42 = vrot.slane %v1294_v41, 4  ;;  %v644_v43 = vmul.f32 %v1294_v41, %v1294_v41 }
 0x231   :  { %v638_v44 = vadd.f32 %v637_v42, %v1294_v41  ;;  %v651_v45 = vrot.slane %v644_v43, 4 }
 0x233   :  { %v639_v46 = vrot.slane %v638_v44, 2  ;;  %v652_v47 = vadd.f32 %v651_v45, %v644_v43 }
 0x234   :  { %v1300_v48 = vpop.f32.mrf.mxu2 }
 0x235   :  { %v640_v35 = vadd.f32 %v639_v46, %v638_v44  ;;  %v653_v49 = vrot.slane %v652_v47, 2  ;;  %v631_v50 = vrot.slane %v1300_v48, 4  ;;  %v643_v51 = vmul.f32 %v1300_v48, %v1300_v48 }
 0x236   :  { %v627_v52 = vpop.f32.mrf.mxu0 }
 0x237   :  { %v641_v53 = vrot.slane %v640_v35, 1  ;;  %v654_v54 = vadd.f32 %v653_v49, %v652_v47  ;;  %v632_v55 = vadd.f32 %v631_v50, %v1300_v48  ;;  %v645_v56 = vrot.slane %v643_v51, 4 }
 0x239   :  { %v642_v57 = vadd.f32 %v641_v53, %v640_v35  ;;  %v655_v58 = vrot.slane %v654_v54, 1  ;;  %v633_v59 = vrot.slane %v632_v55, 2  ;;  %v646_v60 = vadd.f32 %v645_v56, %v643_v51 }
 0x23b   :  { %v656_v61 = vadd.f32 %v655_v58, %v654_v54  ;;  %v658_v62 = vmul.f32 0.125, %v642_v57  ;;  %v634_v63 = vadd.f32 %v633_v59, %v632_v55  ;;  %v647_v0 = vrot.slane %v646_v60, 2 }
 0x23c   :  { %v614_v1 = vpop.f32.mrf.mxu2 }
 0x23d   :  { %v660_v2 = vmul.f32 0.125, %v656_v61  ;;  %v662_v3 = vmul.f32 %v658_v62, %v658_v62  ;;  %v635_v4 = vrot.slane %v634_v63, 1  ;;  %v648_v5 = vadd.f32 %v647_v0, %v646_v60 }
 0x23f   :  { %v664_v6 = vsub.f32 %v660_v2, %v662_v3  ;;  %v636_v7 = vadd.f32 %v635_v4, %v634_v63  ;;  %v649_v8 = vrot.slane %v648_v5, 1 }
 0x241   :  { %v666_v9 = vmax.f32 %v664_v6, 0.0  ;;  %v650_v10 = vadd.f32 %v649_v8, %v648_v5  ;;  %v657_v11 = vmul.f32 0.125, %v636_v7 }
 0x243   :  { %v668_v12 = vadd.f32 1e-05, %v666_v9  ;;  %v659_v13 = vmul.f32 0.125, %v650_v10  ;;  %v661_v14 = vmul.f32 %v657_v11, %v657_v11 }
 0x245   :  { %980 = vrsqrt.f32 %v668_v12  ;;  %v663_v15 = vsub.f32 %v659_v13, %v661_v14  ;;  %vm685_vm9 = vweird.f32 %v668_v12 }
 0x247   :  { %v665_v16 = vmax.f32 %v663_v15, 0.0 }
 0x249   :  { %v667_v17 = vadd.f32 1e-05, %v665_v16 }
 0x24b   :  { %v981_v18 = vpop.eup %980  ;;  %982 = vrsqrt.f32 %v667_v17  ;;  %vm675_vm12 = vweird.f32 %v667_v17 }
 0x24c   :  { %v680_v19 = vmul.f32 %v981_v18, %v668_v12  ;;  %vm686_vm8 = vweird.f32 %v981_v18 }
 0x24d   :  { %vm687_vm10 = vmor %vm685_vm9, %vm686_vm8 }
 0x24e   :  { %v681_v20 = vmul.f32 %v981_v18, %v680_v19 }
 0x250   :  { %v682_v21 = vmul.f32 0.5, %v681_v20 }
 0x251   :  { %v983_v22 = vpop.eup %982 }
 0x252   :  { %v670_v23 = vmul.f32 %v983_v22, %v667_v17  ;;  %v683_v24 = vsub.f32 1.5, %v682_v21  ;;  %vm676_vm11 = vweird.f32 %v983_v22 }
 0x253   :  { %vm677_vm14 = vmor %vm675_vm12, %vm676_vm11 }
 0x254   :  { %v671_v25 = vmul.f32 %v983_v22, %v670_v23  ;;  %v684_v26 = vmul.f32 %v981_v18, %v683_v24 }
 0x256   :  { %v672_v27 = vmul.f32 0.5, %v671_v25  ;;  %v688_v29 = vsel %vm687_vm10, %v981_v18, %v684_v26 }
 0x257   :  { %v691_v32 = vrot.slane %v688_v29, 7 }
 0x258   :  { %v673_v28 = vsub.f32 1.5, %v672_v27 }
 0x25a   :  { %v674_v30 = vmul.f32 %v983_v22, %v673_v28 }
 0x25c   :  { %v678_v33 = vsel %vm677_vm14, %v983_v22, %v674_v30 }
 0x25d   :  { %v693_v34 = vsel %vm692_vm13, %v678_v33, %v691_v32 }
 0x25e   :  { %v695_v36 = vmul.f32 %v693_v34, %v629_v31 }
 0x260   :  { %v697_v37 = vperm.slane %v695_v36, 0  ;;  %v698_v38 = vperm.slane %v695_v36, 1 }
 0x262   :  { %v702_v39 = vmul.f32 %v698_v38, %v658_v62  ;;  %v701_v42 = vmul.f32 %v697_v37, %v657_v11  ;;  %v709_v46 = vmul.f32 %v697_v37, %v1300_v48  ;;  %v710_v35 = vmul.f32 %v698_v38, %v1294_v41 }
 0x264   :  { %v705_v43 = vrot.slane %v702_v39, 7 }
 0x266   :  { %v706_v44 = vsel %vm692_vm13, %v701_v42, %v705_v43 }
 0x267   :  { %v708_v45 = vsub.f32 %v630_v40, %v706_v44 }
 0x269   :  { %v712_v47 = vperm.slane %v708_v45, 0  ;;  %v713_v49 = vperm.slane %v708_v45, 1 }
 0x26b   :  { %v716_v50 = vadd.f32 %v712_v47, %v709_v46  ;;  %v717_v51 = vadd.f32 %v713_v49, %v710_v35 }
 0x26d   :  { %v718_v52 = vmul.f32 0.5, %v716_v50  ;;  %v719_v53 = vmul.f32 0.5, %v717_v51 }
 0x26f   :  { %984 = vtanh.f32 %v718_v52 }
 0x270   :  { %986 = vtanh.f32 %v719_v53 }
 0x275   :  { %v985_v54 = vpop.eup %984 }
 0x276   :  { %v987_v55 = vpop.eup %986  ;;  %v722_v56 = vadd.f32 1.0, %v985_v54 }
 0x277   :  { %v723_v48 = vadd.f32 1.0, %v987_v55 }
 0x278   :  { %v724_v57 = vmul.f32 0.5, %v722_v56 }
 0x279   :  { %v725_v58 = vmul.f32 0.5, %v723_v48 }
 0x27a   :  { %726 = vst [vmem:[#allocation14] sm:$0xff] %v724_v57 }
 0x27b   :  { %727 = vst [vmem:[#allocation14 + $0x8] sm:$0xff] %v725_v58 }
 0x27c   :  { %738 = dma.vmem_to_hbm [thread:$0]  %s734_s9, 256, %s736_s30, [#allocation4]  }
 0x27d   :  { %1188 = dma.done.wait [#allocation4], 256  }
 0x27e   :  { %1189 = vsyncadd [#allocation4], 4294967040 }
 0x27f   :  { %743 = vsyncpa [#allocation3], 1 }
 0x280   :  { %744 = vsyncpa [#allocation6], 1 }
 0x281   :  { %745 = vsyncpa [#allocation9], 1 }
 0x282   :  { %746 = vsyncpa [#allocation12], 1 }
 0x283   :  { %747 = vsyncpa [#allocation4], 1 }

</bundles_post_ra>
